<compile_context>
chip_gen: v7x
topology: tpu7x:2x2x1
jax: 0.10.0
libtpu: 0.0.40
codegen_flags: <defaults>
</compile_context>

<pallas_src>
import functools

import jax
import jax.numpy as jnp
import numpy as np
from jax.experimental import pallas as pl
from jax.experimental.pallas import tpu as pltpu

QUANTILES = (0.0, 0.25, 0.5, 0.75, 1.0)


def _round_up(x, m):
    return ((x + m - 1) // m) * m


def _vmem_limit_bytes():
    # Per-generation scoped-VMEM budget: ~48 MiB on v7x (64 MiB physical),
    # ~96 MiB on v5e/v6e (128 MiB physical).
    try:
        cap = int(pltpu.get_tpu_info().vmem_capacity_bytes)
    except Exception:
        cap = 64 * 1024 * 1024
    return min(100 * 1024 * 1024, max(32 * 1024 * 1024, (cap * 3) // 4))


def _pick_tile_rows(rows_per_slab, batch, chunk_cap_bytes):
    """Chunk size (in rows of 128 lanes) minimizing HBM bytes + per-step overhead."""
    cap_rows = max(8, (chunk_cap_bytes // (batch * 128 * 4)) // 8 * 8)
    cands, tr = [], 8
    while tr < cap_rows:
        cands.append(tr)
        tr *= 2
    cands.append(cap_rows)
    best_tr, best_cost = 8, None
    for tr in cands:
        padded_rows = sum(-(-r // tr) * tr for r in rows_per_slab)
        n_chunks = sum(-(-r // tr) for r in rows_per_slab)
        cost = padded_rows * 128 * batch * 4 / 1.2e12 + n_chunks * 0.35e-6
        if best_cost is None or cost < best_cost:
            best_tr, best_cost = tr, cost
    return best_tr


def _build_worklist(rows_pad_list, tile_rows):
    """Flat chunk work-list (slab id, row-block, first, last, valid) split in two halves."""
    n_slabs = len(rows_pad_list)
    chunks = [r // tile_rows for r in rows_pad_list]
    row_blk_off, off = [], 0
    for r in rows_pad_list:
        row_blk_off.append(off // tile_rows)
        off += r
    g_total = sum(chunks)

    n_splits = 2 if (n_slabs >= 2 and g_total >= 2) else 1
    if n_splits == 2:
        prefix, best_k, best_gap = 0, 1, None
        for k in range(1, n_slabs):
            prefix += chunks[k - 1]
            gap = abs(2 * prefix - g_total)
            if best_gap is None or gap < best_gap:
                best_k, best_gap = k, gap
        halves = [range(0, best_k), range(best_k, n_slabs)]
    else:
        halves = [range(0, n_slabs)]

    def entries(slab_range):
        ent = []
        for s in slab_range:
            for c in range(chunks[s]):
                ent.append((s, row_blk_off[s] + c,
                            1 if c == 0 else 0,
                            1 if c == chunks[s] - 1 else 0,
                            1))
        return ent

    per_half = [entries(h) for h in halves]
    g_half = max(len(e) for e in per_half)
    flat = []
    for ent in per_half:
        # no-op pad entries: re-point at the last real chunk (no DMA re-fetch),
        # compute + init/finalize all gated off.
        pad = (ent[-1][0], ent[-1][1], 0, 0, 0)
        flat.extend(ent + [pad] * (g_half - len(ent)))
    arr = np.asarray(flat, dtype=np.int32)
    cols = tuple(jnp.asarray(arr[:, i]) for i in range(5))
    return cols, n_splits, g_half


# ---------------------------------------------------------------------------
# Kernel 1: per-slab mean / unbiased variance, work-list chunked reduction.
# ---------------------------------------------------------------------------
def _moments_kernel(slab_id_ref, row_blk_ref, first_ref, last_ref, valid_ref,
                    counts_ref, data_ref, shift_ref, mom_ref, sum_ref, ssq_ref):
    idx = pl.program_id(0) * pl.num_programs(1) + pl.program_id(1)
    sid = slab_id_ref[idx]

    @pl.when(first_ref[idx] == 1)
    def _():
        sum_ref[...] = jnp.zeros_like(sum_ref)
        ssq_ref[...] = jnp.zeros_like(ssq_ref)

    @pl.when(valid_ref[idx] == 1)
    def _():
        sh = shift_ref[sid]                               # (B, 1), VMEM-resident
        d = data_ref[...] - sh[:, :, None]                # (B, tile_rows, 128)
        # Lane-shaped partials: pure vreg adds per chunk, no narrow stores.
        sum_ref[...] += jnp.sum(d, axis=1)                # (B, 128)
        ssq_ref[...] += jnp.sum(d * d, axis=1)

    @pl.when(last_ref[idx] == 1)
    def _():
        n = counts_ref[sid].astype(jnp.float32)
        sd = jnp.sum(sum_ref[...], axis=-1, keepdims=True)    # (B, 1)
        ssd = jnp.sum(ssq_ref[...], axis=-1, keepdims=True)
        mean = shift_ref[sid] + sd / n
        # unbiased (ddof=1); clamp tiny negative rounding; n==1 -> NaN like torch.var
        var = jnp.maximum((ssd - sd * sd / n) / (n - 1.0), 0.0)
        mom_ref[0, :, :] = jnp.concatenate([mean, var], axis=-1)


def _compute_moments(data, shift_arr, counts, wl_cols, n_splits, g_half,
                     tile_rows, vmem_limit):
    slab_id, row_blk, first, last, valid = wl_cols
    n_slabs, B = shift_arr.shape[0], shift_arr.shape[1]
    total = int(data.size)

    def data_map(h, g, sid, rb, fi, la, va, cn):
        return (0, rb[h * g_half + g], 0)

    def shift_map(h, g, sid, rb, fi, la, va, cn):
        return (0, 0, 0)                       # whole array, fetched once

    def out_map(h, g, sid, rb, fi, la, va, cn):
        return (sid[h * g_half + g], 0, 0)

    return pl.pallas_call(
        _moments_kernel,
        out_shape=jax.ShapeDtypeStruct((n_slabs, B, 2), jnp.float32),
        grid_spec=pltpu.PrefetchScalarGridSpec(
            num_scalar_prefetch=6,
            grid=(n_splits, g_half),
            in_specs=[
                pl.BlockSpec((B, tile_rows, 128), data_map),
                pl.BlockSpec((n_slabs, B, 1), shift_map),
            ],
            out_specs=pl.BlockSpec((1, B, 2), out_map),
            scratch_shapes=[pltpu.VMEM((B, 128), jnp.float32),
                            pltpu.VMEM((B, 128), jnp.float32)],
        ),
        compiler_params=pltpu.CompilerParams(
            dimension_semantics=("parallel", "arbitrary"),
            vmem_limit_bytes=vmem_limit),
        cost_estimate=pl.CostEstimate(
            flops=4 * total,
            transcendentals=0,
            bytes_accessed=4 * total + 4 * n_slabs * B * 3),
    )(slab_id, row_blk, first, last, valid, counts, data, shift_arr)


# ---------------------------------------------------------------------------
# Kernel 2: 3-layer MLP head, biases folded via a constant-1 feature column.
# ---------------------------------------------------------------------------
def _head_kernel(x_ref, w1_ref, w2_ref, w3_ref, out_ref, *, sigmoid):
    h = jnp.maximum(jnp.dot(x_ref[...], w1_ref[...],
                            preferred_element_type=jnp.float32), 0.0)
    h = jnp.maximum(jnp.dot(h, w2_ref[...],
                            preferred_element_type=jnp.float32), 0.0)
    y = jnp.dot(h, w3_ref[...], preferred_element_type=jnp.float32)
    if sigmoid:
        y = jax.nn.sigmoid(y)
    out_ref[...] = y.astype(out_ref.dtype)


# ---------------------------------------------------------------------------
# Wrapper
# ---------------------------------------------------------------------------
def statnet_forward(params, mlp, *, sigmoid=False):
    """params: list of (weight (B,1,out,in), bias (B,1,out)); mlp: (W1,b1,W2,b2,W3,b3)."""
    w1, b1, w2, b2, w3, b3 = mlp
    B = params[0][0].shape[0]
    f32 = jnp.float32
    vmem_limit = _vmem_limit_bytes()

    # TODO(synk): the full per-tensor sort backing torch.quantile has no clean
    # Pallas TPU primitive and dominates end-to-end time for large NFN inputs;
    # a partial selection at the 10 static ranks would remove most of it.
    slabs = []
    for w, b in params:
        slabs.append(jnp.sort(w.reshape(B, -1).astype(f32), axis=-1))
        slabs.append(jnp.sort(b.reshape(B, -1).astype(f32), axis=-1))
    n_slabs = len(slabs)
    sizes = [int(s.shape[-1]) for s in slabs]

    # Static quantile tap indices + interpolation fractions (torch 'linear').
    lo_idx, hi_idx, fracs = [], [], []
    for n in sizes:
        li, hii, fr = [], [], []
        for q in QUANTILES:
            pos = q * (n - 1)
            lo = int(pos)
            hi = min(lo + 1, n - 1)
            li.append(lo); hii.append(hi); fr.append(pos - lo)
        lo_idx.append(li); hi_idx.append(hii); fracs.append(fr)

    # Per-(slab,batch) median: centering shift AND padding fill, so padding
    # contributes exactly zero to the shifted moment sums.
    shifts = [s[:, (n - 1) // 2] for s, n in zip(slabs, sizes)]       # each (B,)

    # --- kernel 1: lane-dense (B, rows, 128) work-list reduction -------------
    rows = [-(-n // 128) for n in sizes]
    tile_rows = _pick_tile_rows(rows, B, min(16 * 1024 * 1024, vmem_limit // 6))
    rows_pad = [-(-r // tile_rows) * tile_rows for r in rows]

    # TODO(synk): if incoming NFN weights are bf16, keep the slabs bf16 in HBM
    # and upcast inside the kernel to halve kernel-1 HBM traffic.
    parts = []
    for s, n, rp, sh in zip(slabs, sizes, rows_pad, shifts):
        pad = rp * 128 - n
        if pad:
            fill = jnp.broadcast_to(sh[:, None], (B, pad))
            s = jnp.concatenate([s, fill], axis=-1)
        parts.append(s.reshape(B, rp, 128))
    data = jnp.concatenate(parts, axis=1) if len(parts) > 1 else parts[0]
    shift_arr = jnp.stack(shifts, axis=0)[..., None]                  # (n_slabs, B, 1)
    counts = jnp.asarray(sizes, dtype=jnp.int32)

    wl_cols, n_splits, g_half = _build_worklist(rows_pad, tile_rows)
    moments = _compute_moments(data, shift_arr, counts, wl_cols, n_splits,
                               g_half, tile_rows, vmem_limit)         # (n_slabs, B, 2)

    # --- feature assembly: tiny static gathers + interpolation (XLA glue) ----
    F = n_slabs * 7
    lo_t = jnp.stack([jnp.take(s, jnp.asarray(li, dtype=jnp.int32), axis=1)
                      for s, li in zip(slabs, lo_idx)], axis=1)       # (B, n_slabs, 5)
    hi_t = jnp.stack([jnp.take(s, jnp.asarray(hii, dtype=jnp.int32), axis=1)
                      for s, hii in zip(slabs, hi_idx)], axis=1)
    fr = jnp.asarray(np.asarray(fracs, np.float32))                   # (n_slabs, 5)
    quants = lo_t * (1.0 - fr) + hi_t * fr
    feats = jnp.concatenate([jnp.transpose(moments, (1, 0, 2)), quants],
                            axis=-1).reshape(B, F)

    # --- kernel 2: MLP head -----------------------------------------------
    h_size = w1.shape[0]
    F_pad = _round_up(F + 1, 128)
    h_pad = _round_up(h_size + 1, 128)
    tile_b = min(128, _round_up(B, 8))
    B_pad = _round_up(B, tile_b)

    # Constant-1 column at index F carries the biases through both matmuls.
    x_aug = (jnp.zeros((B_pad, F_pad), f32)
             .at[:B, :F].set(feats)
             .at[:B, F].set(1.0))
    W1T = (jnp.zeros((F_pad, h_pad), f32)
           .at[:F, :h_size].set(w1.T.astype(f32))
           .at[F, :h_size].set(b1.astype(f32))
           .at[F, h_size].set(1.0))
    W2T = (jnp.zeros((h_pad, h_pad), f32)
           .at[:h_size, :h_size].set(w2.T.astype(f32))
           .at[h_size, :h_size].set(b2.astype(f32))
           .at[h_size, h_size].set(1.0))
    W3T = (jnp.zeros((h_pad, 1), f32)
           .at[:h_size, 0].set(w3.reshape(-1).astype(f32))
           .at[h_size, 0].set(b3.astype(f32)[0]))

    kernel = functools.partial(_head_kernel, sigmoid=sigmoid)
    head_flops = 2 * B_pad * (F_pad * h_pad + h_pad * h_pad + h_pad)
    head_bytes = 4 * (B_pad * F_pad + F_pad * h_pad + h_pad * h_pad + h_pad + B_pad)
    out = pl.pallas_call(
        kernel,
        out_shape=jax.ShapeDtypeStruct((B_pad, 1), jnp.float32),
        grid=(B_pad // tile_b,),
        in_specs=[pl.BlockSpec((tile_b, F_pad), lambda i: (i, 0)),
                  pl.BlockSpec((F_pad, h_pad), lambda i: (0, 0)),
                  pl.BlockSpec((h_pad, h_pad), lambda i: (0, 0)),
                  pl.BlockSpec((h_pad, 1), lambda i: (0, 0))],
        out_specs=pl.BlockSpec((tile_b, 1), lambda i: (i, 0)),
        compiler_params=pltpu.CompilerParams(
            dimension_semantics=("parallel",), vmem_limit_bytes=vmem_limit),
        cost_estimate=pl.CostEstimate(flops=head_flops, transcendentals=0,
                                      bytes_accessed=head_bytes),
    )(x_aug, W1T, W2T, W3T)
    return out[:B]


# ---------------------------------------------------------------------------
# Pure-JAX reference mirroring the torch module.
# ---------------------------------------------------------------------------
def statnet_reference(params, mlp, *, sigmoid=False):
    w1, b1, w2, b2, w3, b3 = mlp
    q = jnp.array(QUANTILES, dtype=jnp.float32)
    feats = []
    for w, b in params:
        for t in (w, b):
            tf = t.reshape(t.shape[0], t.shape[1], -1)          # (B, C, N)
            mean = tf.mean(-1)
            var = tf.var(-1, ddof=1)
            qs = jnp.quantile(tf, q, axis=-1)                    # (5, B, C)
            feats.append(jnp.stack([mean, var, *qs], axis=-1))   # (B, C, 7)
    x = jnp.concatenate(feats, axis=-2)
    x = x.reshape(x.shape[0], -1)
    h = jax.nn.relu(x @ w1.T + b1)
    h = jax.nn.relu(h @ w2.T + b2)
    y = h @ w3.T + b3
    return jax.nn.sigmoid(y) if sigmoid else y


if __name__ == "__main__":
    key = jax.random.PRNGKey(0)
    B = 2          # batch of input networks
    h_size = 32    # StatNet hidden size
    # synthetic weight-space input: a 3-layer MLP with dims 8 -> 16 -> 16 -> 4
    layer_dims = [(16, 8), (16, 16), (4, 16)]   # (n_out, n_in) per layer
    n_layers = len(layer_dims)
    F = 2 * n_layers * 7                        # StatFeaturizer.get_num_outs

    keys = jax.random.split(key, 2 * n_layers + 6)
    params = []
    for i, (n_out, n_in) in enumerate(layer_dims):
        kw, kb = keys[2 * i], keys[2 * i + 1]
        w = jax.random.normal(kw, (B, 1, n_out, n_in), dtype=jnp.float32)
        b = jax.random.normal(kb, (B, 1, n_out), dtype=jnp.float32)
        params.append((w, b))

    km = keys[2 * n_layers:]
    W1 = jax.random.normal(km[0], (h_size, F), dtype=jnp.float32) / jnp.sqrt(F)
    b1 = jax.random.normal(km[1], (h_size,), dtype=jnp.float32) * 0.1
    W2 = jax.random.normal(km[2], (h_size, h_size), dtype=jnp.float32) / jnp.sqrt(h_size)
    b2 = jax.random.normal(km[3], (h_size,), dtype=jnp.float32) * 0.1
    W3 = jax.random.normal(km[4], (1, h_size), dtype=jnp.float32) / jnp.sqrt(h_size)
    b3 = jax.random.normal(km[5], (1,), dtype=jnp.float32) * 0.1
    mlp = (W1, b1, W2, b2, W3, b3)

    out = statnet_forward(params, mlp, sigmoid=False)
    out = jax.block_until_ready(out)

    ref = statnet_reference(params, mlp, sigmoid=False)
    assert out.shape == (B, 1)
    assert jnp.allclose(out, ref, rtol=1e-4, atol=1e-4), (out, ref)
    print("KERNEL_OK")
</pallas_src>

<mosaic_0001>
module attributes {stable_mosaic.version = 11 : i64} {
  func.func @_moments_kernel(%arg0: i32, %arg1: i32, %arg2: memref<6xi32, #tpu.memory_space<smem>>, %arg3: memref<6xi32, #tpu.memory_space<smem>>, %arg4: memref<6xi32, #tpu.memory_space<smem>>, %arg5: memref<6xi32, #tpu.memory_space<smem>>, %arg6: memref<6xi32, #tpu.memory_space<smem>>, %arg7: memref<6xi32, #tpu.memory_space<smem>>, %arg8: memref<2x8x128xf32, #tpu.memory_space<vmem>>, %arg9: memref<6x2x1xf32, #tpu.memory_space<vmem>>, %arg10: memref<1x2x2xf32, #tpu.memory_space<vmem>>, %arg11: memref<2x128xf32, #tpu.memory_space<vmem>>, %arg12: memref<2x128xf32, #tpu.memory_space<vmem>>) attributes {dimension_semantics = [#tpu.dimension_semantics<parallel>, #tpu.dimension_semantics<arbitrary>], iteration_bounds = array<i64: 2, 3>, scalar_prefetch = 6 : i64, scratch_operands = 2 : i64, tpu.core_type = #tpu.core_type<tc>, window_params = [{transform_indices = @transform_0, window_bounds = array<i64: 2, 8, 128>}, {pipeline_mode = #tpu.pipeline_mode<synchronous>, transform_indices = @transform_1, window_bounds = array<i64: 6, 2, 1>}, {transform_indices = @transform_2, window_bounds = array<i64: 1, 2, 2>}]} {
    %c3_i32 = arith.constant 3 : i32
    %0 = arith.muli %arg0, %c3_i32 : i32
    %1 = arith.addi %0, %arg1 : i32
    %2 = arith.index_cast %1 : i32 to index
    %3 = memref.load %arg2[%2] : memref<6xi32, #tpu.memory_space<smem>>
    %4 = arith.index_cast %1 : i32 to index
    %5 = memref.load %arg4[%4] : memref<6xi32, #tpu.memory_space<smem>>
    %c1_i32 = arith.constant 1 : i32
    %6 = arith.cmpi eq, %5, %c1_i32 : i32
    %7 = arith.extui %6 : i1 to i32
    %c0_i32 = arith.constant 0 : i32
    %8 = arith.cmpi ne, %7, %c0_i32 : i32
    scf.if %8 {
      %cst = arith.constant 0.000000e+00 : f32
      %19 = vector.broadcast %cst : f32 to vector<2x128xf32>
      %c0 = arith.constant 0 : index
      %c0_4 = arith.constant 0 : index
      %20 = vector.load %arg11[%c0, %c0_4] : memref<2x128xf32, #tpu.memory_space<vmem>>, vector<2x128xf32>
      tpu.vector_store %arg11[%c0, %c0_4], %19 {strides = array<i32>} : memref<2x128xf32, #tpu.memory_space<vmem>>, vector<2x128xf32>,
      %cst_5 = arith.constant 0.000000e+00 : f32
      %21 = vector.broadcast %cst_5 : f32 to vector<2x128xf32>
      %c0_6 = arith.constant 0 : index
      %c0_7 = arith.constant 0 : index
      %22 = vector.load %arg12[%c0_6, %c0_7] : memref<2x128xf32, #tpu.memory_space<vmem>>, vector<2x128xf32>
      tpu.vector_store %arg12[%c0_6, %c0_7], %21 {strides = array<i32>} : memref<2x128xf32, #tpu.memory_space<vmem>>, vector<2x128xf32>,
    } else {
    }
    %9 = arith.index_cast %1 : i32 to index
    %10 = memref.load %arg6[%9] : memref<6xi32, #tpu.memory_space<smem>>
    %c1_i32_0 = arith.constant 1 : i32
    %11 = arith.cmpi eq, %10, %c1_i32_0 : i32
    %12 = arith.extui %11 : i1 to i32
    %c0_i32_1 = arith.constant 0 : i32
    %13 = arith.cmpi ne, %12, %c0_i32_1 : i32
    scf.if %13 {
      %19 = arith.index_cast %3 : i32 to index
      %c0 = arith.constant 0 : index
      %c0_4 = arith.constant 0 : index
      %20 = vector.load %arg9[%19, %c0, %c0_4] : memref<6x2x1xf32, #tpu.memory_space<vmem>>, vector<1x2x1xf32>
      %21 = vector.shape_cast %20 : vector<1x2x1xf32> to vector<2x1xf32>
      %c0_5 = arith.constant 0 : index
      %c0_6 = arith.constant 0 : index
      %c0_7 = arith.constant 0 : index
      %22 = vector.load %arg8[%c0_5, %c0_6, %c0_7] : memref<2x8x128xf32, #tpu.memory_space<vmem>>, vector<2x8x128xf32>
      %23 = vector.shape_cast %21 : vector<2x1xf32> to vector<2x1x1xf32>
      %24 = vector.broadcast %23 : vector<2x1x1xf32> to vector<2x8x128xf32>
      %25 = arith.subf %22, %24 : vector<2x8x128xf32>
      %c0_8 = arith.constant 0 : index
      %c0_9 = arith.constant 0 : index
      %26 = vector.load %arg11[%c0_8, %c0_9] : memref<2x128xf32, #tpu.memory_space<vmem>>, vector<2x128xf32>
      %cst = arith.constant dense<0.000000e+00> : vector<2x128xf32>
      %27 = vector.multi_reduction <add>, %25, %cst [1] : vector<2x8x128xf32> to vector<2x128xf32>
      %28 = arith.addf %26, %27 : vector<2x128xf32>
      %c0_10 = arith.constant 0 : index
      %c0_11 = arith.constant 0 : index
      %29 = vector.load %arg11[%c0_10, %c0_11] : memref<2x128xf32, #tpu.memory_space<vmem>>, vector<2x128xf32>
      tpu.vector_store %arg11[%c0_10, %c0_11], %28 {strides = array<i32>} : memref<2x128xf32, #tpu.memory_space<vmem>>, vector<2x128xf32>,
      %c0_12 = arith.constant 0 : index
      %c0_13 = arith.constant 0 : index
      %30 = vector.load %arg12[%c0_12, %c0_13] : memref<2x128xf32, #tpu.memory_space<vmem>>, vector<2x128xf32>
      %31 = arith.mulf %25, %25 : vector<2x8x128xf32>
      %cst_14 = arith.constant dense<0.000000e+00> : vector<2x128xf32>
      %32 = vector.multi_reduction <add>, %31, %cst_14 [1] : vector<2x8x128xf32> to vector<2x128xf32>
      %33 = arith.addf %30, %32 : vector<2x128xf32>
      %c0_15 = arith.constant 0 : index
      %c0_16 = arith.constant 0 : index
      %34 = vector.load %arg12[%c0_15, %c0_16] : memref<2x128xf32, #tpu.memory_space<vmem>>, vector<2x128xf32>
      tpu.vector_store %arg12[%c0_15, %c0_16], %33 {strides = array<i32>} : memref<2x128xf32, #tpu.memory_space<vmem>>, vector<2x128xf32>,
    } else {
    }
    %14 = arith.index_cast %1 : i32 to index
    %15 = memref.load %arg5[%14] : memref<6xi32, #tpu.memory_space<smem>>
    %c1_i32_2 = arith.constant 1 : i32
    %16 = arith.cmpi eq, %15, %c1_i32_2 : i32
    %17 = arith.extui %16 : i1 to i32
    %c0_i32_3 = arith.constant 0 : i32
    %18 = arith.cmpi ne, %17, %c0_i32_3 : i32
    scf.if %18 {
      %19 = arith.index_cast %3 : i32 to index
      %20 = memref.load %arg7[%19] : memref<6xi32, #tpu.memory_space<smem>>
      %21 = arith.sitofp %20 : i32 to f32
      %c0 = arith.constant 0 : index
      %c0_4 = arith.constant 0 : index
      %22 = vector.load %arg11[%c0, %c0_4] : memref<2x128xf32, #tpu.memory_space<vmem>>, vector<2x128xf32>
      %cst = arith.constant dense<0.000000e+00> : vector<2xf32>
      %23 = vector.multi_reduction <add>, %22, %cst [1] : vector<2x128xf32> to vector<2xf32>
      %24 = vector.shape_cast %23 : vector<2xf32> to vector<2x1xf32>
      %c0_5 = arith.constant 0 : index
      %c0_6 = arith.constant 0 : index
      %25 = vector.load %arg12[%c0_5, %c0_6] : memref<2x128xf32, #tpu.memory_space<vmem>>, vector<2x128xf32>
      %cst_7 = arith.constant dense<0.000000e+00> : vector<2xf32>
      %26 = vector.multi_reduction <add>, %25, %cst_7 [1] : vector<2x128xf32> to vector<2xf32>
      %27 = vector.shape_cast %26 : vector<2xf32> to vector<2x1xf32>
      %28 = arith.index_cast %3 : i32 to index
      %c0_8 = arith.constant 0 : index
      %c0_9 = arith.constant 0 : index
      %29 = vector.load %arg9[%28, %c0_8, %c0_9] : memref<6x2x1xf32, #tpu.memory_space<vmem>>, vector<1x2x1xf32>
      %30 = vector.shape_cast %29 : vector<1x2x1xf32> to vector<2x1xf32>
      %31 = vector.broadcast %21 : f32 to vector<2x1xf32>
      %32 = arith.divf %24, %31 : vector<2x1xf32>
      %33 = arith.addf %30, %32 : vector<2x1xf32>
      %34 = arith.mulf %24, %24 : vector<2x1xf32>
      %35 = vector.broadcast %21 : f32 to vector<2x1xf32>
      %36 = arith.divf %34, %35 : vector<2x1xf32>
      %37 = arith.subf %27, %36 : vector<2x1xf32>
      %cst_10 = arith.constant 1.000000e+00 : f32
      %38 = arith.subf %21, %cst_10 : f32
      %39 = vector.broadcast %38 : f32 to vector<2x1xf32>
      %40 = arith.divf %37, %39 : vector<2x1xf32>
      %cst_11 = arith.constant 0.000000e+00 : f32
      %41 = vector.broadcast %cst_11 : f32 to vector<2x1xf32>
      %42 = arith.maximumf %40, %41 : vector<2x1xf32>
      %43 = tpu.concatenate %33, %42 in 1 : vector<2x1xf32>, vector<2x1xf32> -> vector<2x2xf32>
      %c0_12 = arith.constant 0 : index
      %c0_13 = arith.constant 0 : index
      %c0_14 = arith.constant 0 : index
      %44 = vector.load %arg10[%c0_12, %c0_13, %c0_14] : memref<1x2x2xf32, #tpu.memory_space<vmem>>, vector<1x2x2xf32>
      %45 = vector.shape_cast %44 : vector<1x2x2xf32> to vector<2x2xf32>
      %46 = vector.shape_cast %43 : vector<2x2xf32> to vector<1x2x2xf32>
      tpu.vector_store %arg10[%c0_12, %c0_13, %c0_14], %46 {strides = array<i32>} : memref<1x2x2xf32, #tpu.memory_space<vmem>>, vector<1x2x2xf32>,
    } else {
    }
    return
  }
  func.func @transform_0(%arg0: i32, %arg1: i32, %arg2: memref<6xi32, #tpu.memory_space<smem>>, %arg3: memref<6xi32, #tpu.memory_space<smem>>, %arg4: memref<6xi32, #tpu.memory_space<smem>>, %arg5: memref<6xi32, #tpu.memory_space<smem>>, %arg6: memref<6xi32, #tpu.memory_space<smem>>, %arg7: memref<6xi32, #tpu.memory_space<smem>>) -> (i32, i32, i32) {
    %c3_i32 = arith.constant 3 : i32
    %0 = arith.muli %arg0, %c3_i32 : i32
    %1 = arith.addi %0, %arg1 : i32
    %2 = arith.index_cast %1 : i32 to index
    %3 = memref.load %arg3[%2] : memref<6xi32, #tpu.memory_space<smem>>
    %c0_i32 = arith.constant 0 : i32
    %c0_i32_0 = arith.constant 0 : i32
    %c0_i32_1 = arith.constant 0 : i32
    return %c0_i32, %3, %c0_i32_0 : i32, i32, i32
  }
  func.func @transform_1(%arg0: i32, %arg1: i32, %arg2: memref<6xi32, #tpu.memory_space<smem>>, %arg3: memref<6xi32, #tpu.memory_space<smem>>, %arg4: memref<6xi32, #tpu.memory_space<smem>>, %arg5: memref<6xi32, #tpu.memory_space<smem>>, %arg6: memref<6xi32, #tpu.memory_space<smem>>, %arg7: memref<6xi32, #tpu.memory_space<smem>>) -> (i32, i32, i32) {
    %c0_i32 = arith.constant 0 : i32
    %c0_i32_0 = arith.constant 0 : i32
    %c0_i32_1 = arith.constant 0 : i32
    %c0_i32_2 = arith.constant 0 : i32
    return %c0_i32, %c0_i32_0, %c0_i32_1 : i32, i32, i32
  }
  func.func @transform_2(%arg0: i32, %arg1: i32, %arg2: memref<6xi32, #tpu.memory_space<smem>>, %arg3: memref<6xi32, #tpu.memory_space<smem>>, %arg4: memref<6xi32, #tpu.memory_space<smem>>, %arg5: memref<6xi32, #tpu.memory_space<smem>>, %arg6: memref<6xi32, #tpu.memory_space<smem>>, %arg7: memref<6xi32, #tpu.memory_space<smem>>) -> (i32, i32, i32) {
    %c3_i32 = arith.constant 3 : i32
    %0 = arith.muli %arg0, %c3_i32 : i32
    %1 = arith.addi %0, %arg1 : i32
    %2 = arith.index_cast %1 : i32 to index
    %3 = memref.load %arg2[%2] : memref<6xi32, #tpu.memory_space<smem>>
    %c0_i32 = arith.constant 0 : i32
    %c0_i32_0 = arith.constant 0 : i32
    %c0_i32_1 = arith.constant 0 : i32
    return %3, %c0_i32, %c0_i32_0 : i32, i32, i32
  }
}

</mosaic_0001>

<bundles_post_ra>
// kernel: tpu_custom_call.1
= control target key start
LH: loop header
LB: loop body
LE: loop exit
PB: predicated region body
PF: predicated region fallthrough
CT: control target
= control target key end

     0   :  { %s999_s0 = inlined_call_operand.vmem [shape: s32[6], index: 0, kind: input, shape index: {}]   ;;  %s1000_s6 = inlined_call_operand.hbm [shape: f32[2,48,128], index: 6, kind: input, shape index: {}]   ;;  %s1001_s7 = inlined_call_operand.vmem [shape: f32[6,2,1], index: 7, kind: input, shape index: {}]   ;;  %s1002_s8 = inlined_call_operand.vmem [shape: f32[6,2,2], index: 8, kind: output, shape index: {}]   ;;  %s1003_s1 = inlined_call_operand.vmem [shape: s32[6], index: 1, kind: input, shape index: {}]   ;;  %s1004_s2 = inlined_call_operand.vmem [shape: s32[6], index: 2, kind: input, shape index: {}]   ;;  %s1005_s3 = inlined_call_operand.vmem [shape: s32[6], index: 3, kind: input, shape index: {}]   ;;  %s1006_s4 = inlined_call_operand.vmem [shape: s32[6], index: 4, kind: input, shape index: {}]   ;;  %s1007_s5 = inlined_call_operand.vmem [shape: s32[6], index: 5, kind: input, shape index: {}]  }
   0x1   :  { %s13_s29 = sshll.u32 %s999_s0, 4  ;;  %s17_s10 = sshll.u32 %s1003_s1, 4  ;;  %s14_s29 = int_to_ptr.vmem [resolvable:$true] %s13_s29  ;;  %s18_s10 = int_to_ptr.vmem [resolvable:$true] %s17_s10 }
   0x2   :  { %s568_s11 = scalar_lea.vmem %s14_s29, 16  ;;  %p573_p1 = scmp.lt.s32.totalorder %s14_s29, %s14_s29 }
   0x3   :  { %p569_p0 = scmp.ne.s32.totalorder %s14_s29, %s568_s11  ;;  %p574_p2 = scmp.lt.s32.totalorder %s568_s11, %s568_s11 }
   0x5   :  { %p575_p3 = por %p574_p2, %p573_p1 }
   0x7   :  { %p576_p4 = pnand %p575_p3, %p569_p0 }
   0x9   :  { %579 = shalt.err (!%p576_p4)  }
   0xa   :  { %s740_s12 = smov [#allocation5]   ;;  %s580_s13 = scalar_lea.vmem %s18_s10, 16 }
   0xb   :  { %16 = dma.vmem_to_smem %s14_s29, 16, %s740_s12, [#allocation4] }
   0xc   :  { %p581_p5 = scmp.ne.s32.totalorder %s18_s10, %s580_s13  ;;  %p585_p6 = scmp.lt.s32.totalorder %s18_s10, %s18_s10 }
   0xd   :  { %p586_p7 = scmp.lt.s32.totalorder %s580_s13, %s580_s13 }
   0xf   :  { %p587_p8 = por %p586_p7, %p585_p6 }
  0x11   :  { %p588_p9 = pnand %p587_p8, %p581_p5 }
  0x13   :  { %591 = shalt.err (!%p588_p9)  }
  0x14   :  { %s741_s0 = smov [#allocation6]   ;;  %s21_s15 = sshll.u32 %s1004_s2, 4  ;;  %s22_s15 = int_to_ptr.vmem [resolvable:$true] %s21_s15 }
  0x15   :  { %20 = dma.vmem_to_smem %s18_s10, 16, %s741_s0, [#allocation4] }
  0x16   :  { %s25_s18 = sshll.u32 %s1005_s3, 4  ;;  %s592_s19 = scalar_lea.vmem %s22_s15, 16  ;;  %s26_s18 = int_to_ptr.vmem [resolvable:$true] %s25_s18 }
  0x17   :  { %p593_p10 = scmp.ne.s32.totalorder %s22_s15, %s592_s19  ;;  %p597_p11 = scmp.lt.s32.totalorder %s22_s15, %s22_s15 }
  0x18   :  { %p598_p12 = scmp.lt.s32.totalorder %s592_s19, %s592_s19 }
  0x1a   :  { %p599_p13 = por %p598_p12, %p597_p11 }
  0x1c   :  { %p600_p0 = pnand %p599_p13, %p593_p10 }
  0x1e   :  { %603 = shalt.err (!%p600_p0)  }
  0x1f   :  { %s742_s20 = smov [#allocation7]   ;;  %s604_s21 = scalar_lea.vmem %s26_s18, 16 }
  0x20   :  { %24 = dma.vmem_to_smem %s22_s15, 16, %s742_s20, [#allocation4] }
  0x21   :  { %p605_p1 = scmp.ne.s32.totalorder %s26_s18, %s604_s21  ;;  %p609_p2 = scmp.lt.s32.totalorder %s26_s18, %s26_s18 }
  0x22   :  { %p610_p3 = scmp.lt.s32.totalorder %s604_s21, %s604_s21 }
  0x24   :  { %p611_p4 = por %p610_p3, %p609_p2 }
  0x26   :  { %p612_p5 = pnand %p611_p4, %p605_p1 }
  0x28   :  { %615 = shalt.err (!%p612_p5)  }
  0x29   :  { %s743_s2 = smov [#allocation8]   ;;  %s29_s23 = sshll.u32 %s1006_s4, 4  ;;  %s30_s23 = int_to_ptr.vmem [resolvable:$true] %s29_s23 }
  0x2a   :  { %28 = dma.vmem_to_smem %s26_s18, 16, %s743_s2, [#allocation4] }
  0x2b   :  { %s33_s26 = sshll.u32 %s1007_s5, 4  ;;  %s616_s27 = scalar_lea.vmem %s30_s23, 16  ;;  %s34_s26 = int_to_ptr.vmem [resolvable:$true] %s33_s26 }
  0x2c   :  { %p617_p6 = scmp.ne.s32.totalorder %s30_s23, %s616_s27  ;;  %p621_p7 = scmp.lt.s32.totalorder %s30_s23, %s30_s23 }
  0x2d   :  { %p622_p8 = scmp.lt.s32.totalorder %s616_s27, %s616_s27 }
  0x2f   :  { %p623_p9 = por %p622_p8, %p621_p7 }
  0x31   :  { %p624_p10 = pnand %p623_p9, %p617_p6 }
  0x33   :  { %627 = shalt.err (!%p624_p10)  }
  0x34   :  { %s744_s28 = smov [#allocation9]   ;;  %s628_s29 = scalar_lea.vmem %s34_s26, 16 }
  0x35   :  { %32 = dma.vmem_to_smem %s30_s23, 16, %s744_s28, [#allocation4] }
  0x36   :  { %p629_p11 = scmp.ne.s32.totalorder %s34_s26, %s628_s29  ;;  %p633_p12 = scmp.lt.s32.totalorder %s34_s26, %s34_s26 }
  0x37   :  { %p634_p13 = scmp.lt.s32.totalorder %s628_s29, %s628_s29 }
  0x39   :  { %p635_p0 = por %p634_p13, %p633_p12 }
  0x3b   :  { %p636_p1 = pnand %p635_p0, %p629_p11 }
  0x3d   :  { %639 = shalt.err (!%p636_p1)  }
  0x3e   :  { %s745_s4 = smov [#allocation10]  }
  0x3f   :  { %36 = dma.vmem_to_smem %s34_s26, 16, %s745_s4, [#allocation4] }
  0x40   :  { %702 = dma.done.wait [#allocation4], 96 }
  0x41   :  { %703 = vsyncadd [#allocation4], 4294967200 }
  0x42   :  { %38 = sfence }
  0x43   :  { %39 = vsyncpa [#allocation12], 0 }
  0x44   :  { %41 = vsyncpa [#allocation12 + $0x1], 0  ;;  %s816_s5 = smov 0   ;;  %s818_s30 = smov 0  }
  0x45   :  { %s820_s9 = smov 0   ;;  %s822_s10 = smov 0  }
  0x46   :  { %s824_s11 = smov 0   ;;  %s826_s12 = smov 0  }
  0x47   :  { %s828_s13 = smov 0   ;;  %s830_s0 = smov 0  }
  0x48 LB: > { %s56_s1 = sadd.s32 1, %s730_s12  ;;  %s59_s14 = sadd.s32 1, %s734_s13  ;;  %s738_s0 = sphi %s830_s0, %s47_s0   ;;  %s734_s13 = sphi %s828_s13, %s1020_s13   ;;  %s730_s12 = sphi %s826_s12, %s1019_s12   ;;  %s726_s11 = sphi %s824_s11, %s1018_s11   ;;  %s722_s10 = sphi %s822_s10, %s1017_s10   ;;  %s718_s9 = sphi %s820_s9, %s1016_s9   ;;  %s714_s30 = sphi %s818_s30, %s1015_s30   ;;  %s710_s5 = sphi %s816_s5, %s1014_s5  }
  0x49   : > { %p57_p2 = scmp.ge.s32.totalorder %s56_s1, 3  ;;  %s63_s15 = smul.u32 3, %s734_s13 }
  0x4a   : > { %s458_s16 = sadd.s32 4294967295, %s738_s0   ;;  %p79_p4 = scmp.ne.s32.totalorder %s718_s9, %s714_s30 }
  0x4b   : > { %s1022_s1 = smov (%p57_p2, %s56_s1), 0  ;;  %s1024_s14 = smov (!%p57_p2, %s59_s14), %s734_s13 }
  0x4c   : > { %s64_s17 = sadd.s32 %s730_s12, %s63_s15  ;;  %p61_p3 = scmp.ge.s32.totalorder %s1024_s14, 2 }
  0x4d   : > { %p80_p5 = scmp.eq.s32.totalorder %s738_s0, 0  ;;  %p85_p6 = scmp.ne.s32.totalorder %s714_s30, %s710_s5 }
  0x4e   : > { %s1026_s14 = smov (%p61_p3, %s1024_s14), 0  ;;  %s65_s18 = sld [smem:[#allocation6 + %s64_s17]] }
  0x4f   : > { %p86_p7 = scmp.eq.s32.totalorder %s458_s16, 0  ;;  %s66_s19 = smul.u32 3, %s1026_s14 }
  0x50   : > { %p869_p8 = por %p80_p5, %p79_p4  ;;  %s165_s3 = sand.u32 1, %s718_s9  }
  0x51   : > { %p873_p9 = por %p86_p7, %p85_p6  ;;  %s67_s2 = sadd.s32 %s66_s19, %s1022_s1 }
  0x52   : > { %s68_s22 = sld [smem:[#allocation6 + %s67_s2]]  ;;  %p486_p10 = scmp.lt.s32.totalorder %s738_s0, 6 }
  0x53   : > { %s1010_s21 = scalar_select %p873_p9, 1, 0 }
  0x54   : > { %s72_s23 = sadd.s32 1, %s718_s9  ;;  %s462_s24 = sshll.u32 %s165_s3, 4 }
  0x55   : > { %s476_s25 = scalar_select %p869_p8, [#allocation6], [#allocation13] }
  0x56   : > { %s1028_s17 = smov (!%p869_p8, %s64_s17), 0  ;;  %p887_p11 = pnand %p486_p10, %p869_p8 }
  0x57   : > { %s1030_s25 = smov (!%p486_p10, %s476_s25), [#allocation14]  ;;  %s1032_s17 = smov (!%p486_p10, %s1028_s17), 0 }
  0x58   : > { %s69_s26 = ssub.s32 %s65_s18, %s68_s22  ;;  %s172_s29 = sld [smem:[%s1030_s25 + %s1032_s17]] }
  0x59   : > { %p70_p12 = scmp.eq.s32.totalorder %s69_s26, 0  ;;  %s169_s4 = scalar_lea.vmem [#allocation11], %s462_s24 }
  0x5a   : > { %s178_s5 = sshll.u32 %s169_s4, 4  ;;  %p464_p13 = scmp.ge.s32.totalorder %s738_s0, 1  ;;  %s896_s5 = int_to_ptr.vmem [resolvable:$true] %s178_s5 }
  0x5b   : > { %s892_s28 = scalar_select %p70_p12, %s718_s9, %s72_s23  }
  0x5c   : > { %p186_p0 = scmp.lt.s32.totalorder %s738_s0, 7  ;;  %s907_s17 = scalar_lea.sflag [#allocation12], %s165_s3 }
  0x5d   : > { %p642_p3 = pneg %p887_p11  ;;  %s645_s24 = scalar_lea.hbm %s1000_s6, 1536 }
  0x5e   : > { %p898_p1 = pnand %p464_p13, %p186_p0  ;;  %s463_s16 = sshll.u32 %s172_s29, 7 }
  0x5f   : > { %s905_s20 = scalar_lea.hbm %s1000_s6, %s463_s16 }
  0x60   : > { %s640_s2 = scalar_lea.hbm %s905_s20, 256  ;;  %p646_p6 = scmp.lt.u32.totalorder %s905_s20, %s1000_s6 }
  0x61   : > { %p641_p2 = scmp.ne.s32.totalorder %s905_s20, %s640_s2  ;;  %p647_p7 = scmp.lt.u32.totalorder %s645_s24, %s640_s2 }
  0x62   : > { %p649_p10 = scmp.lt.u32.totalorder %s640_s2, %s905_s20 }
  0x63   : > { %p643_p4 = pnand %p642_p3, %p641_p2  ;;  %p648_p8 = por %p647_p7, %p646_p6 }
  0x65   : > { %p644_p5 = pneg %p643_p4  ;;  %p650_p12 = por %p649_p10, %p648_p8 }
  0x67   : > { %p651_p13 = pnand %p650_p12, %p644_p5 }
  0x69   : > { %654 = shalt.err (!%p651_p13)
}
  0x6a   : > { %s655_s3 = scalar_lea.vmem %s896_s5, 256  ;;  %s746_s29 = smov [#allocation11]  }
  0x6b   : > { %p656_p0 = scmp.ne.s32.totalorder %s896_s5, %s655_s3  ;;  %s660_s4 = sshll.u32 %s746_s29, 4  ;;  %s661_s4 = int_to_ptr.vmem [resolvable:$false] %s660_s4 }
  0x6c   : > { %s662_s16 = scalar_lea.vmem %s661_s4, 512  ;;  %p663_p9 = scmp.lt.s32.totalorder %s896_s5, %s661_s4 }
  0x6d   : > { %p658_p2 = pnand %p656_p0, %p642_p3  ;;  %p664_p6 = scmp.lt.s32.totalorder %s662_s16, %s655_s3 }
  0x6f   : > { %p659_p4 = pneg %p658_p2  ;;  %p665_p7 = por %p664_p6, %p663_p9 }
  0x71   : > { %p666_p8 = pnand %p665_p7, %p659_p4 }
  0x73   : > { %669 = shalt.err (!%p666_p8)
}
  0x74   : > { %s747_s18 = smov 768   ;;  %s748_s19 = smov 128  }
  0x75   : > { %s749_s2 = smov 8   ;;  %190 = sbr.rel (%p898_p1) target bundleno = 478 (0x1de), region = 28 }
  0x76   : > { %485 = dma.hbm_to_vmem [thread:$0]  (!%p887_p11), %s905_s20, 256, %s896_s5, %s907_s17, %s747_s18, %s748_s19, %s749_s2  }
  0x77   : > { %s192_s22 = sand.u32 (!%p898_p1), 1, %s714_s30   ;;  %p1013_p9 = scmp.ne.s32.totalorder (!%p898_p1), %s1010_s21, 0 }
  0x78   : > { %s938_s23 = sshll.u32 (!%p898_p1), %s192_s22, 4  ;;  %s193_s24 = scalar_lea.sflag (!%p898_p1), [#allocation12], %s192_s22 }
  0x79   : > { %s196_s25 = scalar_lea.vmem (!%p898_p1), [#allocation11], %s938_s23 }
  0x7c   : > { %705 = dma.done.wait (%p1013_p9), %s193_s24, 256  }
  0x7d   : > { %707 = vsyncadd (%p1013_p9), %s193_s24, 4294967040  ;;  %s222_s27 = smul.u32 3, %s726_s11 }
  0x7f   : > { %s947_s5 = sadd.s32 %s722_s10, %s222_s27 }
  0x80   : > { %s224_s15 = sld [smem:[#allocation5 + %s947_s5]] }
  0x81   : > { %s951_s20 = sld [smem:[#allocation5 + %s947_s5]] }
  0x82   : > { %s235_s17 = sld [smem:[#allocation7 + %s947_s5]] }
  0x86   : > { %p225_p11 = scmp.lt.s32.totalorder %s224_s15, 5 }
  0x88   : > { %s1034_s15 = smov (!%p225_p11, %s224_s15), 5  ;;  %p467_p1 = scmp.ne.s32.totalorder %s235_s17, 1 }
  0x89   : > { %s466_s26 = sshll.u32 %s1034_s15, 1  ;;  %v750_v0 = vmov (!%p467_p1), 0.0  }
  0x8a   : > { %s957_s21 = scalar_lea.vmem %s1002_s8, %s466_s26  ;;  %239 = sbr.rel (%p467_p1) target bundleno = 145 (0x91), region = 36  ;;  %240 = vst [vmem:[#allocation2] sm:$0x3] (!%p467_p1), %v750_v0  ;;  %241 = vst [vmem:[#allocation3] sm:$0x3] (!%p467_p1), %v750_v0 }
  0x91 PF: > { %s242_s10 = sld [smem:[#allocation9 + %s947_s5]] }
  0x97   : > { %p468_p3 = scmp.ne.s32.totalorder %s242_s10, 1 }
  0x98   : > { %s469_s11 = sshll.u32 (!%p468_p3), %s951_s20, 1  ;;  %v264_v1 = vlaneseq (!%p468_p3)  ;;  %v751_v2 = vmov (!%p468_p3), 0   ;;  %v752_v3 = vmov (!%p468_p3), 1966171168   ;;  %v250_v15 = vld [vmem:[%s196_s25] sm:$0xff] (!%p468_p3)  ;;  %v251_v18 = vld [vmem:[%s196_s25 + $0x8] sm:$0xff] (!%p468_p3) }
  0x99   : > { %246 = sbr.rel (%p468_p3) target bundleno = 315 (0x13b), region = 40  ;;  %563 = vset.pattern.permute.xlu0 (!%p468_p3), %v751_v2  ;;  %s248_s18 = scalar_lea.vmem (!%p468_p3), %s1001_s7, %s469_s11  ;;  %v262_v4 = vunpack.c.l.s4 (!%p468_p3), %v752_v3  ;;  %vm308_vm0 = vcmask (!%p468_p3), 1041409   ;;  %v293_v43 = vld [vmem:[#allocation2] sm:$0x3] (!%p468_p3)  ;;  %v313_v47 = vld [vmem:[#allocation3] sm:$0x3] (!%p468_p3) }
  0x9a   : > { %v470_v5 = vld.sshfl [vmem:[%s248_s18] sm:$0x11 pattern:$0x75316420] (!%p468_p3)  ;;  %v265_v6 = vshrl.u32 (!%p468_p3), %v264_v1, 7 }
  0x9b   : > { %v263_v7 = vunpack.c.0.s8 (!%p468_p3), %v262_v4  ;;  %v260_v8 = vcombine.high (!%p468_p3), %v470_v5, %v470_v5 }
  0x9c   : > { %v277_v10 = vsub.s32 (!%p468_p3), 0, %v265_v6 }
  0x9d   : > { %v266_v9 = vsub.s32 (!%p468_p3), %v263_v7, %v265_v6 }
  0x9f   : > { %v267_v11 = vrot.slane (!%p468_p3), %v470_v5, %v266_v9  ;;  %v274_v12 = vrot.slane (!%p468_p3), %v260_v8, %v266_v9 }
  0xa1   : > { %v278_v13 = vrot.slane %v267_v11, %v277_v10  ;;  %v282_v14 = vrot.slane %v274_v12, %v277_v10 }
  0xa3   : > { %284 = vperm.xlu0 %563, %v278_v13  }
  0xa7   : > { %288 = vperm.xlu0 %563, %v282_v14  }
 0x122   : > { %v285_v16 = vpop.permute.xlu0 %284 }
 0x123   : > { %v291_v17 = vsub.f32 %v250_v15, %v285_v16 }
 0x125   : > { %v294_v19 = vrot.slane %v291_v17, 4  ;;  %v314_v20 = vmul.f32 %v291_v17, %v291_v17 }
 0x126   : > { %v289_v21 = vpop.permute.xlu0 %288 }
 0x127   : > { %v295_v22 = vadd.f32 %v294_v19, %v291_v17  ;;  %v316_v23 = vrot.slane %v314_v20, 4  ;;  %v292_v24 = vsub.f32 %v251_v18, %v289_v21 }
 0x129   : > { %v296_v25 = vrot.slane %v295_v22, 2  ;;  %v317_v26 = vadd.f32 %v316_v23, %v314_v20  ;;  %v300_v27 = vrot.slane %v292_v24, 4  ;;  %v315_v28 = vmul.f32 %v292_v24, %v292_v24 }
 0x12b   : > { %v297_v29 = vadd.f32 %v296_v25, %v295_v22  ;;  %v318_v30 = vrot.slane %v317_v26, 2  ;;  %v301_v31 = vadd.f32 %v300_v27, %v292_v24  ;;  %v322_v32 = vrot.slane %v315_v28, 4 }
 0x12d   : > { %v319_v33 = vadd.f32 %v318_v30, %v317_v26  ;;  %v302_v34 = vrot.slane %v301_v31, 2  ;;  %v323_v35 = vadd.f32 %v322_v32, %v315_v28  ;;  %v298_v36 = vrot.slane %v297_v29, 1 }
 0x12f   : > { %v303_v37 = vadd.f32 %v302_v34, %v301_v31  ;;  %v324_v38 = vrot.slane %v323_v35, 2  ;;  %v320_v39 = vrot.slane %v319_v33, 1  ;;  %v299_v42 = vadd.f32 %v298_v36, %v297_v29 }
 0x131   : > { %v304_v40 = vrot.slane %v303_v37, 1  ;;  %v325_v41 = vadd.f32 %v324_v38, %v323_v35  ;;  %v321_v46 = vadd.f32 %v320_v39, %v319_v33 }
 0x133   : > { %v305_v44 = vadd.f32 %v304_v40, %v303_v37  ;;  %v326_v45 = vrot.slane %v325_v41, 1 }
 0x135   : > { %v309_v48 = vsel %vm308_vm0, %v305_v44, %v299_v42  ;;  %v327_v49 = vadd.f32 %v326_v45, %v325_v41 }
 0x136   : > { %v311_v50 = vadd.f32 %v309_v48, %v293_v43 }
 0x137   : > { %v330_v51 = vsel %vm308_vm0, %v327_v49, %v321_v46 }
 0x138   : > { %312 = vst [vmem:[#allocation2] sm:$0x3] %v311_v50  ;;  %v332_v52 = vadd.f32 %v330_v51, %v313_v47 }
 0x13a   : > { %333 = vst [vmem:[#allocation3] sm:$0x3] %v332_v52 }
 0x13b PF: > { %s334_s19 = sld [smem:[#allocation8 + %s947_s5]] }
 0x141   : > { %p471_p5 = scmp.ne.s32.totalorder %s334_s19, 1 }
 0x142   : > { %v341_v53 = vld [vmem:[#allocation2] sm:$0x3] (!%p471_p5)  ;;  %vm342_vm1 = vcmask (!%p471_p5), 1041408   ;;  %v346_v54 = vld [vmem:[#allocation3] sm:$0x3] (!%p471_p5)  ;;  %s339_s2 = sld [smem:[#allocation10 + %s951_s20]] (!%p471_p5) }
 0x143   : > { %338 = sbr.rel (%p471_p5) target bundleno = 478 (0x1de), region = 44  ;;  %v343_v55 = vsel (!%p471_p5), %vm342_vm1, %v341_v53, 0.0  ;;  %v347_v56 = vsel (!%p471_p5), %vm342_vm1, %v346_v54, 0.0  ;;  %s472_s24 = sshll.u32 (!%p471_p5), %s951_s20, 1  ;;  %vm365_vm2 = vcmask (!%p471_p5), 7168   ;;  %vm367_vm3 = vcmask (!%p471_p5), 9216  }
 0x144   : > { %344 = vadd.xlane.f32.xlu0 (!%p471_p5), %v343_v55  ;;  %s351_s5 = scalar_lea.vmem (!%p471_p5), %s1001_s7, %s472_s24 }
 0x145   : > { %v352_v3 = vld [vmem:[%s351_s5] sm:$0x3] (!%p471_p5) }
 0x148   : > { %348 = vadd.xlane.f32.xlu0 (!%p471_p5), %v347_v56  ;;  %s340_s22 = scvt.s32.f32 (!%p471_p5), %s339_s2 }
 0x14a   : > { %s473_s23 = sadd.f32 -1.0, %s340_s22  ;;  %v353_v57 = vstv %s340_s22 }
 0x14b   : > { %564 = vrcp.f32 %v353_v57 }
 0x14c   : > { %v361_v58 = vstv %s473_s23 }
 0x14d   : > { %566 = vrcp.f32 %v361_v58 }
 0x155   : > { %v565_v61 = vpop.eup %564 }
 0x157   : > { %v567_v63 = vpop.eup %566 }
 0x1d1   : > { %v345_v59 = vpop.xlane.xlu0 %344 }
 0x1d2   : > { %v357_v60 = vmul.f32 %v345_v59, %v345_v59  ;;  %v355_v1 = vmul.f32 %v565_v61, %v345_v59 }
 0x1d4   : > { %v358_v62 = vmul.f32 %v565_v61, %v357_v60  ;;  %v356_v5 = vadd.f32 %v355_v1, %v352_v3 }
 0x1d5   : > { %v349_v0 = vpop.xlane.xlu0 %348 }
 0x1d6   : > { %v359_v2 = vsub.f32 %v349_v0, %v358_v62 }
 0x1d8   : > { %v363_v4 = vmul.f32 %v567_v63, %v359_v2 }
 0x1da   : > { %v364_v6 = vmax.f32 %v363_v4, 0.0 }
 0x1dc   : > { %v366_v7 = vsel %vm365_vm2, %v356_v5, %v364_v6 }
 0x1dd   : > { %368 = vst.msk [vmem:[%s957_s21] sm:$0x3] %vm367_vm3, %v366_v7 }
 0x1de PF: > { %s47_s0 = sadd.s32 1, %s738_s0   ;;  %s1014_s5 = smov %s714_s30 }
 0x1df   : > { %p44_p10 = scmp.ge.s32.totalorder %s47_s0, 8   ;;  %s1015_s30 = smov %s718_s9 }
 0x1e0   : > { %s1016_s9 = smov %s892_s28  ;;  %s1017_s10 = smov %s730_s12 }
 0x1e1   : > { %s1018_s11 = smov %s734_s13  ;;  %s1019_s12 = smov %s1022_s1 }
 0x1e2   : > { %s1020_s13 = smov %s1026_s14  ;;  %46 = sbr.rel (!%p44_p10) target bundleno = 72 (0x48), region = 82 }
 0x1e9   :  { %397 = vsyncpa [#allocation12], 1 }
 0x1ea   :  { %399 = vsyncpa [#allocation12 + $0x1], 1 }

</bundles_post_ra>
